<compile_context>
chip_gen: v5e
topology: v5e:2x2
jax: 0.10.0
libtpu: 0.0.40
codegen_flags: <defaults>
</compile_context>

<pallas_src>
import functools

import numpy as np
import jax
import jax.numpy as jnp
from jax import lax
from jax.experimental import pallas as pl
from jax.experimental.pallas import tpu as pltpu


def _mha_kernel(*refs, n_head, d_k, d_v, bt, len_q, len_k, eps, emit_attn,
                mxu_dtype):
    if emit_attn:
        (q_ref, k_ref, v_ref, wq_ref, wk_ref, wv_ref, wo_ref,
         gamma_ref, beta_ref, out_ref, attn_ref, oconc_ref) = refs
    else:
        (q_ref, k_ref, v_ref, wq_ref, wk_ref, wv_ref, wo_ref,
         gamma_ref, beta_ref, out_ref, oconc_ref) = refs
        attn_ref = None

    if mxu_dtype is None:
        cast = lambda x: x
    else:
        cast = lambda x: x.astype(mxu_dtype)

    q2 = q_ref[...]                       # (bt*len_q, d_model) f32
    k2 = k_ref[...]                       # (bt*len_k, d_model)
    v2 = v_ref[...]                       # (bt*len_k, d_model)

    # Fused-batch QKV projections (Linear, bias=False) on the MXU, f32 acc.
    # Weights were cast to mxu_dtype at the wrapper boundary.
    qp = jnp.dot(cast(q2), wq_ref[...], preferred_element_type=jnp.float32)
    kp = jnp.dot(cast(k2), wk_ref[...], preferred_element_type=jnp.float32)
    vp = jnp.dot(cast(v2), wv_ref[...], preferred_element_type=jnp.float32)
    # 1/temperature applied once to the whole Q projection (hoisted).
    qp = qp * (1.0 / (d_k ** 0.5))

    # Per-head scaled-dot-product attention; heads statically unrolled.
    for h in range(n_head):
        qh = qp[:, h * d_k:(h + 1) * d_k].reshape(bt, len_q, d_k)
        kh = kp[:, h * d_k:(h + 1) * d_k].reshape(bt, len_k, d_k)
        vh = vp[:, h * d_v:(h + 1) * d_v].reshape(bt, len_k, d_v)

        scores = jnp.einsum('bqd,bkd->bqk', cast(qh), cast(kh),
                            preferred_element_type=jnp.float32)  # (bt,Lq,Lk)

        # Numerically-stable softmax over keys (f32); divide -> EUP reciprocal.
        m = jnp.max(scores, axis=-1, keepdims=True)
        e = jnp.exp(scores - m)
        denom = jnp.sum(e, axis=-1, keepdims=True)
        attn = e * pl.reciprocal(denom, approx=True)

        if attn_ref is not None:
            # Heads concatenated on the lane axis -> lane-dense HBM writeback.
            attn_ref[:, h * len_k:(h + 1) * len_k] = (
                attn.reshape(bt * len_q, len_k).astype(attn_ref.dtype))
        # TODO(synk): attention dropout omitted (eval-mode identity).

        oh = jnp.einsum('bqk,bkd->bqd', cast(attn), cast(vh),
                        preferred_element_type=jnp.float32)      # (bt,Lq,dv)
        # Stash this head's output in the concat scratch (bounds live ranges).
        oconc_ref[:, h * d_v:(h + 1) * d_v] = oh.reshape(bt * len_q, d_v)

    # Single output projection over the concatenated heads (K = H*d_v).
    out = jnp.dot(cast(oconc_ref[...]), wo_ref[...],
                  preferred_element_type=jnp.float32)            # (rows, d_model)
    # TODO(synk): output dropout omitted (eval-mode identity).
    out = out + q2                                               # residual (f32)

    # LayerNorm over the last dim (biased variance, eps inside sqrt), f32 math.
    mean = jnp.mean(out, axis=-1, keepdims=True)
    cent = out - mean
    var = jnp.mean(cent * cent, axis=-1, keepdims=True)
    normed = cent * lax.rsqrt(var + eps)
    out_ref[...] = (normed * gamma_ref[...] + beta_ref[...]).astype(out_ref.dtype)


def _pick_batch_tile(batch, len_q, target_rows=512):
    """Largest batch tile whose fused row count stays near the MXU sweet spot
    and whose block shape satisfies the (8, 128) sublane rule."""
    if batch * len_q <= target_rows:
        return batch
    best = None
    for cand in range(1, batch):
        if (batch % cand == 0 and (cand * len_q) % 8 == 0
                and cand * len_q <= target_rows):
            best = cand
    return best if best is not None else batch


def multi_head_attention(q, k, v, wq, wk, wv, wo, gamma, beta, *,
                         n_head, d_k, d_v, eps=1e-6,
                         return_attn=True, attn_dtype=jnp.float32,
                         mxu_dtype=jnp.bfloat16, batch_tile=None):
    """q,k,v: (B, L, d_model). Weights laid out (in, out).
    Returns output (B, Lq, d_model) and, if return_attn, attn (B, H, Lq, Lk).
    Set attn_dtype=jnp.bfloat16 to halve attention-probability HBM writeback."""
    B, len_q, d_model = q.shape
    len_k = k.shape[1]
    len_v = v.shape[1]
    assert len_k == len_v, "k and v must share sequence length"

    bt = _pick_batch_tile(B, len_q) if batch_tile is None else batch_tile
    assert B % bt == 0
    grid = (B // bt,)
    rq = bt * len_q
    rk = bt * len_k

    # Cast weights once at the boundary: MXU-native bf16 and half the weight
    # DMA bytes. Activations are cast inside the kernel; residual / softmax /
    # LayerNorm statistics remain f32 (keeps v5e's f32-only VPU/EUP happy).
    if mxu_dtype is not None:
        wq, wk, wv, wo = (w.astype(mxu_dtype) for w in (wq, wk, wv, wo))

    kernel = functools.partial(
        _mha_kernel, n_head=n_head, d_k=d_k, d_v=d_v, bt=bt,
        len_q=len_q, len_k=len_k, eps=eps, emit_attn=return_attn,
        mxu_dtype=mxu_dtype)

    in_specs = [
        pl.BlockSpec((rq, d_model), lambda i: (i, 0)),        # q (flattened)
        pl.BlockSpec((rk, d_model), lambda i: (i, 0)),        # k (flattened)
        pl.BlockSpec((rk, d_model), lambda i: (i, 0)),        # v (flattened)
        pl.BlockSpec(wq.shape, lambda i: (0, 0)),             # W_q
        pl.BlockSpec(wk.shape, lambda i: (0, 0)),             # W_k
        pl.BlockSpec(wv.shape, lambda i: (0, 0)),             # W_v
        pl.BlockSpec(wo.shape, lambda i: (0, 0)),             # W_o (fc)
        pl.BlockSpec((1, d_model), lambda i: (0, 0)),         # LN gamma
        pl.BlockSpec((1, d_model), lambda i: (0, 0)),         # LN beta
    ]

    if return_attn:
        out_shape = (
            jax.ShapeDtypeStruct((B * len_q, d_model), q.dtype),
            jax.ShapeDtypeStruct((B * len_q, n_head * len_k), attn_dtype),
        )
        out_specs = (
            pl.BlockSpec((rq, d_model), lambda i: (i, 0)),
            pl.BlockSpec((rq, n_head * len_k), lambda i: (i, 0)),
        )
    else:
        out_shape = jax.ShapeDtypeStruct((B * len_q, d_model), q.dtype)
        out_specs = pl.BlockSpec((rq, d_model), lambda i: (i, 0))

    call = pl.pallas_call(
        kernel,
        out_shape=out_shape,
        grid=grid,
        in_specs=in_specs,
        out_specs=out_specs,
        scratch_shapes=[pltpu.VMEM((rq, n_head * d_v), jnp.float32)],
        compiler_params=pltpu.CompilerParams(
            dimension_semantics=("parallel",),   # batch tiles -> both TCs (v7x)
        ),
    )

    qf = q.reshape(B * len_q, d_model)
    kf = k.reshape(B * len_k, d_model)
    vf = v.reshape(B * len_v, d_model)

    res = call(qf, kf, vf, wq, wk, wv, wo, gamma, beta)

    if return_attn:
        out_flat, attn_flat = res
        out = out_flat.reshape(B, len_q, d_model)
        attn = attn_flat.reshape(B, len_q, n_head, len_k).transpose(0, 2, 1, 3)
        return out, attn
    return res.reshape(B, len_q, d_model)


def _mha_reference(q, k, v, wq, wk, wv, wo, gamma, beta, *, n_head, d_k, d_v,
                   eps=1e-6):
    """Pure-JAX reference with the PyTorch module's semantics (eval mode)."""
    B, Lq, d_model = q.shape
    Lk = k.shape[1]
    residual = q
    qp = (q @ wq).reshape(B, Lq, n_head, d_k).transpose(0, 2, 1, 3)
    kp = (k @ wk).reshape(B, Lk, n_head, d_k).transpose(0, 2, 1, 3)
    vp = (v @ wv).reshape(B, Lk, n_head, d_v).transpose(0, 2, 1, 3)
    scores = (qp / (d_k ** 0.5)) @ kp.transpose(0, 1, 3, 2)
    attn = jax.nn.softmax(scores, axis=-1)
    out = attn @ vp                                  # (B, H, Lq, dv)
    out = out.transpose(0, 2, 1, 3).reshape(B, Lq, n_head * d_v)
    out = out @ wo + residual
    mean = out.mean(-1, keepdims=True)
    var = ((out - mean) ** 2).mean(-1, keepdims=True)
    out = (out - mean) / jnp.sqrt(var + eps) * gamma + beta
    return out, attn


if __name__ == "__main__":
    # Small shapes consistent with the module: B=2, seq=8, d_model=32,
    # n_head=4, d_k=d_v=8.
    B, L, D_MODEL = 2, 8, 32
    N_HEAD, D_K, D_V = 4, 8, 8

    key = jax.random.PRNGKey(0)
    ks = jax.random.split(key, 7)
    q = jax.random.normal(ks[0], (B, L, D_MODEL), jnp.float32)
    k = jax.random.normal(ks[1], (B, L, D_MODEL), jnp.float32)
    v = jax.random.normal(ks[2], (B, L, D_MODEL), jnp.float32)
    # Weights stored (in, out) so the kernel uses plain x @ W.
    wq = jax.random.normal(ks[3], (D_MODEL, N_HEAD * D_K), jnp.float32) * 0.1
    wk = jax.random.normal(ks[4], (D_MODEL, N_HEAD * D_K), jnp.float32) * 0.1
    wv = jax.random.normal(ks[5], (D_MODEL, N_HEAD * D_V), jnp.float32) * 0.1
    wo = jax.random.normal(ks[6], (N_HEAD * D_V, D_MODEL), jnp.float32) * 0.1
    gamma = jnp.ones((1, D_MODEL), jnp.float32)      # LayerNorm default init
    beta = jnp.zeros((1, D_MODEL), jnp.float32)

    out, attn = multi_head_attention(q, k, v, wq, wk, wv, wo, gamma, beta,
                                     n_head=N_HEAD, d_k=D_K, d_v=D_V)
    jax.block_until_ready((out, attn))

    ref_out, ref_attn = _mha_reference(q, k, v, wq, wk, wv, wo, gamma, beta,
                                       n_head=N_HEAD, d_k=D_K, d_v=D_V)

    assert out.shape == (B, L, D_MODEL), out.shape
    assert attn.shape == (B, N_HEAD, L, L), attn.shape
    assert np.allclose(np.asarray(attn), np.asarray(ref_attn),
                       rtol=2e-2, atol=2e-2), "attn mismatch"
    assert np.allclose(np.asarray(out), np.asarray(ref_out),
                       rtol=2e-2, atol=2e-2), "output mismatch"

    print("KERNEL_OK")
</pallas_src>

<mosaic_0001>
module attributes {stable_mosaic.version = 11 : i64} {
  func.func @_mha_kernel(%arg0: i32, %arg1: memref<16x32xf32, #tpu.memory_space<vmem>>, %arg2: memref<16x32xf32, #tpu.memory_space<vmem>>, %arg3: memref<16x32xf32, #tpu.memory_space<vmem>>, %arg4: memref<32x32xbf16, #tpu.memory_space<vmem>>, %arg5: memref<32x32xbf16, #tpu.memory_space<vmem>>, %arg6: memref<32x32xbf16, #tpu.memory_space<vmem>>, %arg7: memref<32x32xbf16, #tpu.memory_space<vmem>>, %arg8: memref<1x32xf32, #tpu.memory_space<vmem>>, %arg9: memref<1x32xf32, #tpu.memory_space<vmem>>, %arg10: memref<16x32xf32, #tpu.memory_space<vmem>>, %arg11: memref<16x32xf32, #tpu.memory_space<vmem>>, %arg12: memref<16x32xf32, #tpu.memory_space<vmem>>) attributes {dimension_semantics = [#tpu.dimension_semantics<parallel>], iteration_bounds = array<i64: 1>, scalar_prefetch = 0 : i64, scratch_operands = 1 : i64, tpu.core_type = #tpu.core_type<tc>, window_params = [{transform_indices = @transform_0, window_bounds = array<i64: 16, 32>}, {transform_indices = @transform_1, window_bounds = array<i64: 16, 32>}, {transform_indices = @transform_2, window_bounds = array<i64: 16, 32>}, {pipeline_mode = #tpu.pipeline_mode<synchronous>, transform_indices = @transform_3, window_bounds = array<i64: 32, 32>}, {pipeline_mode = #tpu.pipeline_mode<synchronous>, transform_indices = @transform_4, window_bounds = array<i64: 32, 32>}, {pipeline_mode = #tpu.pipeline_mode<synchronous>, transform_indices = @transform_5, window_bounds = array<i64: 32, 32>}, {pipeline_mode = #tpu.pipeline_mode<synchronous>, transform_indices = @transform_6, window_bounds = array<i64: 32, 32>}, {pipeline_mode = #tpu.pipeline_mode<synchronous>, transform_indices = @transform_7, window_bounds = array<i64: 1, 32>}, {pipeline_mode = #tpu.pipeline_mode<synchronous>, transform_indices = @transform_8, window_bounds = array<i64: 1, 32>}, {transform_indices = @transform_9, window_bounds = array<i64: 16, 32>}, {transform_indices = @transform_10, window_bounds = array<i64: 16, 32>}]} {
    %c0 = arith.constant 0 : index
    %c0_0 = arith.constant 0 : index
    %0 = vector.load %arg1[%c0, %c0_0] : memref<16x32xf32, #tpu.memory_space<vmem>>, vector<16x32xf32>
    %c0_1 = arith.constant 0 : index
    %c0_2 = arith.constant 0 : index
    %1 = vector.load %arg2[%c0_1, %c0_2] : memref<16x32xf32, #tpu.memory_space<vmem>>, vector<16x32xf32>
    %c0_3 = arith.constant 0 : index
    %c0_4 = arith.constant 0 : index
    %2 = vector.load %arg3[%c0_3, %c0_4] : memref<16x32xf32, #tpu.memory_space<vmem>>, vector<16x32xf32>
    %3 = arith.truncf %0 : vector<16x32xf32> to vector<16x32xbf16>
    %c0_5 = arith.constant 0 : index
    %c0_6 = arith.constant 0 : index
    %4 = vector.load %arg4[%c0_5, %c0_6] : memref<32x32xbf16, #tpu.memory_space<vmem>>, vector<32x32xbf16>
    %cst = arith.constant dense<0.000000e+00> : vector<16x32xf32>
    %5 = tpu.matmul %3, %4, %cst {dimension_numbers = #tpu.dot_dimension_numbers<[1], [0], [0], [1], [0, 0, 1, 1], [], []>} : vector<16x32xbf16>, vector<32x32xbf16>, vector<16x32xf32> -> vector<16x32xf32>
    %6 = arith.truncf %1 : vector<16x32xf32> to vector<16x32xbf16>
    %c0_7 = arith.constant 0 : index
    %c0_8 = arith.constant 0 : index
    %7 = vector.load %arg5[%c0_7, %c0_8] : memref<32x32xbf16, #tpu.memory_space<vmem>>, vector<32x32xbf16>
    %cst_9 = arith.constant dense<0.000000e+00> : vector<16x32xf32>
    %8 = tpu.matmul %6, %7, %cst_9 {dimension_numbers = #tpu.dot_dimension_numbers<[1], [0], [0], [1], [0, 0, 1, 1], [], []>} : vector<16x32xbf16>, vector<32x32xbf16>, vector<16x32xf32> -> vector<16x32xf32>
    %9 = arith.truncf %2 : vector<16x32xf32> to vector<16x32xbf16>
    %c0_10 = arith.constant 0 : index
    %c0_11 = arith.constant 0 : index
    %10 = vector.load %arg6[%c0_10, %c0_11] : memref<32x32xbf16, #tpu.memory_space<vmem>>, vector<32x32xbf16>
    %cst_12 = arith.constant dense<0.000000e+00> : vector<16x32xf32>
    %11 = tpu.matmul %9, %10, %cst_12 {dimension_numbers = #tpu.dot_dimension_numbers<[1], [0], [0], [1], [0, 0, 1, 1], [], []>} : vector<16x32xbf16>, vector<32x32xbf16>, vector<16x32xf32> -> vector<16x32xf32>
    %cst_13 = arith.constant 0.353553385 : f32
    %12 = vector.broadcast %cst_13 : f32 to vector<16x32xf32>
    %13 = arith.mulf %5, %12 : vector<16x32xf32>
    %14 = vector.extract_strided_slice %13 {offsets = [0, 0], sizes = [16, 8], strides = [1, 1]} : vector<16x32xf32> to vector<16x8xf32>
    %15 = vector.shape_cast %14 : vector<16x8xf32> to vector<2x8x8xf32>
    %16 = vector.extract_strided_slice %8 {offsets = [0, 0], sizes = [16, 8], strides = [1, 1]} : vector<16x32xf32> to vector<16x8xf32>
    %17 = vector.shape_cast %16 : vector<16x8xf32> to vector<2x8x8xf32>
    %18 = vector.extract_strided_slice %11 {offsets = [0, 0], sizes = [16, 8], strides = [1, 1]} : vector<16x32xf32> to vector<16x8xf32>
    %19 = vector.shape_cast %18 : vector<16x8xf32> to vector<2x8x8xf32>
    %20 = arith.truncf %15 : vector<2x8x8xf32> to vector<2x8x8xbf16>
    %21 = arith.truncf %17 : vector<2x8x8xf32> to vector<2x8x8xbf16>
    "tpu.trace_start"() <{level = 10 : i32, message = "bqd,bkd->bqk"}> : () -> ()
    %cst_14 = arith.constant dense<0.000000e+00> : vector<2x8x8xf32>
    %22 = tpu.matmul %20, %21, %cst_14 {dimension_numbers = #tpu.dot_dimension_numbers<[2], [2], [1], [1], [0, 0, 0, 1, 1, 1], [0], [0]>} : vector<2x8x8xbf16>, vector<2x8x8xbf16>, vector<2x8x8xf32> -> vector<2x8x8xf32>
    "tpu.trace_stop"() : () -> ()
    %cst_15 = arith.constant dense<0xFF800000> : vector<2x8xf32>
    %23 = vector.multi_reduction <maximumf>, %22, %cst_15 [2] : vector<2x8x8xf32> to vector<2x8xf32>
    %24 = vector.shape_cast %23 : vector<2x8xf32> to vector<2x8x1xf32>
    %25 = vector.broadcast %24 : vector<2x8x1xf32> to vector<2x8x8xf32>
    %26 = arith.subf %22, %25 : vector<2x8x8xf32>
    %27 = math.exp %26 : vector<2x8x8xf32>
    %cst_16 = arith.constant dense<0.000000e+00> : vector<2x8xf32>
    %28 = vector.multi_reduction <add>, %27, %cst_16 [2] : vector<2x8x8xf32> to vector<2x8xf32>
    %29 = vector.shape_cast %28 : vector<2x8xf32> to vector<2x8x1xf32>
    %30 = tpu.reciprocal %29 {approx = true} : vector<2x8x1xf32> -> vector<2x8x1xf32>
    %31 = vector.broadcast %30 : vector<2x8x1xf32> to vector<2x8x8xf32>
    %32 = arith.mulf %27, %31 : vector<2x8x8xf32>
    %33 = vector.shape_cast %32 : vector<2x8x8xf32> to vector<16x8xf32>
    %c0_17 = arith.constant 0 : index
    %c0_18 = arith.constant 0 : index
    %34 = vector.load %arg11[%c0_17, %c0_18] : memref<16x32xf32, #tpu.memory_space<vmem>>, vector<16x8xf32>
    tpu.vector_store %arg11[%c0_17, %c0_18], %33 {strides = array<i32>} : memref<16x32xf32, #tpu.memory_space<vmem>>, vector<16x8xf32>,
    %35 = arith.truncf %32 : vector<2x8x8xf32> to vector<2x8x8xbf16>
    %36 = arith.truncf %19 : vector<2x8x8xf32> to vector<2x8x8xbf16>
    "tpu.trace_start"() <{level = 10 : i32, message = "bqk,bkd->bqd"}> : () -> ()
    %cst_19 = arith.constant dense<0.000000e+00> : vector<2x8x8xf32>
    %37 = tpu.matmul %35, %36, %cst_19 {dimension_numbers = #tpu.dot_dimension_numbers<[2], [1], [1], [2], [0, 0, 0, 1, 1, 2], [0], [0]>} : vector<2x8x8xbf16>, vector<2x8x8xbf16>, vector<2x8x8xf32> -> vector<2x8x8xf32>
    "tpu.trace_stop"() : () -> ()
    %38 = vector.shape_cast %37 : vector<2x8x8xf32> to vector<16x8xf32>
    %c0_20 = arith.constant 0 : index
    %c0_21 = arith.constant 0 : index
    %39 = vector.load %arg12[%c0_20, %c0_21] : memref<16x32xf32, #tpu.memory_space<vmem>>, vector<16x8xf32>
    tpu.vector_store %arg12[%c0_20, %c0_21], %38 {strides = array<i32>} : memref<16x32xf32, #tpu.memory_space<vmem>>, vector<16x8xf32>,
    %40 = vector.extract_strided_slice %13 {offsets = [0, 8], sizes = [16, 8], strides = [1, 1]} : vector<16x32xf32> to vector<16x8xf32>
    %41 = vector.shape_cast %40 : vector<16x8xf32> to vector<2x8x8xf32>
    %42 = vector.extract_strided_slice %8 {offsets = [0, 8], sizes = [16, 8], strides = [1, 1]} : vector<16x32xf32> to vector<16x8xf32>
    %43 = vector.shape_cast %42 : vector<16x8xf32> to vector<2x8x8xf32>
    %44 = vector.extract_strided_slice %11 {offsets = [0, 8], sizes = [16, 8], strides = [1, 1]} : vector<16x32xf32> to vector<16x8xf32>
    %45 = vector.shape_cast %44 : vector<16x8xf32> to vector<2x8x8xf32>
    %46 = arith.truncf %41 : vector<2x8x8xf32> to vector<2x8x8xbf16>
    %47 = arith.truncf %43 : vector<2x8x8xf32> to vector<2x8x8xbf16>
    "tpu.trace_start"() <{level = 10 : i32, message = "bqd,bkd->bqk"}> : () -> ()
    %cst_22 = arith.constant dense<0.000000e+00> : vector<2x8x8xf32>
    %48 = tpu.matmul %46, %47, %cst_22 {dimension_numbers = #tpu.dot_dimension_numbers<[2], [2], [1], [1], [0, 0, 0, 1, 1, 1], [0], [0]>} : vector<2x8x8xbf16>, vector<2x8x8xbf16>, vector<2x8x8xf32> -> vector<2x8x8xf32>
    "tpu.trace_stop"() : () -> ()
    %cst_23 = arith.constant dense<0xFF800000> : vector<2x8xf32>
    %49 = vector.multi_reduction <maximumf>, %48, %cst_23 [2] : vector<2x8x8xf32> to vector<2x8xf32>
    %50 = vector.shape_cast %49 : vector<2x8xf32> to vector<2x8x1xf32>
    %51 = vector.broadcast %50 : vector<2x8x1xf32> to vector<2x8x8xf32>
    %52 = arith.subf %48, %51 : vector<2x8x8xf32>
    %53 = math.exp %52 : vector<2x8x8xf32>
    %cst_24 = arith.constant dense<0.000000e+00> : vector<2x8xf32>
    %54 = vector.multi_reduction <add>, %53, %cst_24 [2] : vector<2x8x8xf32> to vector<2x8xf32>
    %55 = vector.shape_cast %54 : vector<2x8xf32> to vector<2x8x1xf32>
    %56 = tpu.reciprocal %55 {approx = true} : vector<2x8x1xf32> -> vector<2x8x1xf32>
    %57 = vector.broadcast %56 : vector<2x8x1xf32> to vector<2x8x8xf32>
    %58 = arith.mulf %53, %57 : vector<2x8x8xf32>
    %59 = vector.shape_cast %58 : vector<2x8x8xf32> to vector<16x8xf32>
    %c0_25 = arith.constant 0 : index
    %c8 = arith.constant 8 : index
    %60 = vector.load %arg11[%c0_25, %c8] : memref<16x32xf32, #tpu.memory_space<vmem>>, vector<16x8xf32>
    tpu.vector_store %arg11[%c0_25, %c8], %59 {strides = array<i32>} : memref<16x32xf32, #tpu.memory_space<vmem>>, vector<16x8xf32>,
    %61 = arith.truncf %58 : vector<2x8x8xf32> to vector<2x8x8xbf16>
    %62 = arith.truncf %45 : vector<2x8x8xf32> to vector<2x8x8xbf16>
    "tpu.trace_start"() <{level = 10 : i32, message = "bqk,bkd->bqd"}> : () -> ()
    %cst_26 = arith.constant dense<0.000000e+00> : vector<2x8x8xf32>
    %63 = tpu.matmul %61, %62, %cst_26 {dimension_numbers = #tpu.dot_dimension_numbers<[2], [1], [1], [2], [0, 0, 0, 1, 1, 2], [0], [0]>} : vector<2x8x8xbf16>, vector<2x8x8xbf16>, vector<2x8x8xf32> -> vector<2x8x8xf32>
    "tpu.trace_stop"() : () -> ()
    %64 = vector.shape_cast %63 : vector<2x8x8xf32> to vector<16x8xf32>
    %c0_27 = arith.constant 0 : index
    %c8_28 = arith.constant 8 : index
    %65 = vector.load %arg12[%c0_27, %c8_28] : memref<16x32xf32, #tpu.memory_space<vmem>>, vector<16x8xf32>
    tpu.vector_store %arg12[%c0_27, %c8_28], %64 {strides = array<i32>} : memref<16x32xf32, #tpu.memory_space<vmem>>, vector<16x8xf32>,
    %66 = vector.extract_strided_slice %13 {offsets = [0, 16], sizes = [16, 8], strides = [1, 1]} : vector<16x32xf32> to vector<16x8xf32>
    %67 = vector.shape_cast %66 : vector<16x8xf32> to vector<2x8x8xf32>
    %68 = vector.extract_strided_slice %8 {offsets = [0, 16], sizes = [16, 8], strides = [1, 1]} : vector<16x32xf32> to vector<16x8xf32>
    %69 = vector.shape_cast %68 : vector<16x8xf32> to vector<2x8x8xf32>
    %70 = vector.extract_strided_slice %11 {offsets = [0, 16], sizes = [16, 8], strides = [1, 1]} : vector<16x32xf32> to vector<16x8xf32>
    %71 = vector.shape_cast %70 : vector<16x8xf32> to vector<2x8x8xf32>
    %72 = arith.truncf %67 : vector<2x8x8xf32> to vector<2x8x8xbf16>
    %73 = arith.truncf %69 : vector<2x8x8xf32> to vector<2x8x8xbf16>
    "tpu.trace_start"() <{level = 10 : i32, message = "bqd,bkd->bqk"}> : () -> ()
    %cst_29 = arith.constant dense<0.000000e+00> : vector<2x8x8xf32>
    %74 = tpu.matmul %72, %73, %cst_29 {dimension_numbers = #tpu.dot_dimension_numbers<[2], [2], [1], [1], [0, 0, 0, 1, 1, 1], [0], [0]>} : vector<2x8x8xbf16>, vector<2x8x8xbf16>, vector<2x8x8xf32> -> vector<2x8x8xf32>
    "tpu.trace_stop"() : () -> ()
    %cst_30 = arith.constant dense<0xFF800000> : vector<2x8xf32>
    %75 = vector.multi_reduction <maximumf>, %74, %cst_30 [2] : vector<2x8x8xf32> to vector<2x8xf32>
    %76 = vector.shape_cast %75 : vector<2x8xf32> to vector<2x8x1xf32>
    %77 = vector.broadcast %76 : vector<2x8x1xf32> to vector<2x8x8xf32>
    %78 = arith.subf %74, %77 : vector<2x8x8xf32>
    %79 = math.exp %78 : vector<2x8x8xf32>
    %cst_31 = arith.constant dense<0.000000e+00> : vector<2x8xf32>
    %80 = vector.multi_reduction <add>, %79, %cst_31 [2] : vector<2x8x8xf32> to vector<2x8xf32>
    %81 = vector.shape_cast %80 : vector<2x8xf32> to vector<2x8x1xf32>
    %82 = tpu.reciprocal %81 {approx = true} : vector<2x8x1xf32> -> vector<2x8x1xf32>
    %83 = vector.broadcast %82 : vector<2x8x1xf32> to vector<2x8x8xf32>
    %84 = arith.mulf %79, %83 : vector<2x8x8xf32>
    %85 = vector.shape_cast %84 : vector<2x8x8xf32> to vector<16x8xf32>
    %c0_32 = arith.constant 0 : index
    %c16 = arith.constant 16 : index
    %86 = vector.load %arg11[%c0_32, %c16] : memref<16x32xf32, #tpu.memory_space<vmem>>, vector<16x8xf32>
    tpu.vector_store %arg11[%c0_32, %c16], %85 {strides = array<i32>} : memref<16x32xf32, #tpu.memory_space<vmem>>, vector<16x8xf32>,
    %87 = arith.truncf %84 : vector<2x8x8xf32> to vector<2x8x8xbf16>
    %88 = arith.truncf %71 : vector<2x8x8xf32> to vector<2x8x8xbf16>
    "tpu.trace_start"() <{level = 10 : i32, message = "bqk,bkd->bqd"}> : () -> ()
    %cst_33 = arith.constant dense<0.000000e+00> : vector<2x8x8xf32>
    %89 = tpu.matmul %87, %88, %cst_33 {dimension_numbers = #tpu.dot_dimension_numbers<[2], [1], [1], [2], [0, 0, 0, 1, 1, 2], [0], [0]>} : vector<2x8x8xbf16>, vector<2x8x8xbf16>, vector<2x8x8xf32> -> vector<2x8x8xf32>
    "tpu.trace_stop"() : () -> ()
    %90 = vector.shape_cast %89 : vector<2x8x8xf32> to vector<16x8xf32>
    %c0_34 = arith.constant 0 : index
    %c16_35 = arith.constant 16 : index
    %91 = vector.load %arg12[%c0_34, %c16_35] : memref<16x32xf32, #tpu.memory_space<vmem>>, vector<16x8xf32>
    tpu.vector_store %arg12[%c0_34, %c16_35], %90 {strides = array<i32>} : memref<16x32xf32, #tpu.memory_space<vmem>>, vector<16x8xf32>,
    %92 = vector.extract_strided_slice %13 {offsets = [0, 24], sizes = [16, 8], strides = [1, 1]} : vector<16x32xf32> to vector<16x8xf32>
    %93 = vector.shape_cast %92 : vector<16x8xf32> to vector<2x8x8xf32>
    %94 = vector.extract_strided_slice %8 {offsets = [0, 24], sizes = [16, 8], strides = [1, 1]} : vector<16x32xf32> to vector<16x8xf32>
    %95 = vector.shape_cast %94 : vector<16x8xf32> to vector<2x8x8xf32>
    %96 = vector.extract_strided_slice %11 {offsets = [0, 24], sizes = [16, 8], strides = [1, 1]} : vector<16x32xf32> to vector<16x8xf32>
    %97 = vector.shape_cast %96 : vector<16x8xf32> to vector<2x8x8xf32>
    %98 = arith.truncf %93 : vector<2x8x8xf32> to vector<2x8x8xbf16>
    %99 = arith.truncf %95 : vector<2x8x8xf32> to vector<2x8x8xbf16>
    "tpu.trace_start"() <{level = 10 : i32, message = "bqd,bkd->bqk"}> : () -> ()
    %cst_36 = arith.constant dense<0.000000e+00> : vector<2x8x8xf32>
    %100 = tpu.matmul %98, %99, %cst_36 {dimension_numbers = #tpu.dot_dimension_numbers<[2], [2], [1], [1], [0, 0, 0, 1, 1, 1], [0], [0]>} : vector<2x8x8xbf16>, vector<2x8x8xbf16>, vector<2x8x8xf32> -> vector<2x8x8xf32>
    "tpu.trace_stop"() : () -> ()
    %cst_37 = arith.constant dense<0xFF800000> : vector<2x8xf32>
    %101 = vector.multi_reduction <maximumf>, %100, %cst_37 [2] : vector<2x8x8xf32> to vector<2x8xf32>
    %102 = vector.shape_cast %101 : vector<2x8xf32> to vector<2x8x1xf32>
    %103 = vector.broadcast %102 : vector<2x8x1xf32> to vector<2x8x8xf32>
    %104 = arith.subf %100, %103 : vector<2x8x8xf32>
    %105 = math.exp %104 : vector<2x8x8xf32>
    %cst_38 = arith.constant dense<0.000000e+00> : vector<2x8xf32>
    %106 = vector.multi_reduction <add>, %105, %cst_38 [2] : vector<2x8x8xf32> to vector<2x8xf32>
    %107 = vector.shape_cast %106 : vector<2x8xf32> to vector<2x8x1xf32>
    %108 = tpu.reciprocal %107 {approx = true} : vector<2x8x1xf32> -> vector<2x8x1xf32>
    %109 = vector.broadcast %108 : vector<2x8x1xf32> to vector<2x8x8xf32>
    %110 = arith.mulf %105, %109 : vector<2x8x8xf32>
    %111 = vector.shape_cast %110 : vector<2x8x8xf32> to vector<16x8xf32>
    %c0_39 = arith.constant 0 : index
    %c24 = arith.constant 24 : index
    %112 = vector.load %arg11[%c0_39, %c24] : memref<16x32xf32, #tpu.memory_space<vmem>>, vector<16x8xf32>
    tpu.vector_store %arg11[%c0_39, %c24], %111 {strides = array<i32>} : memref<16x32xf32, #tpu.memory_space<vmem>>, vector<16x8xf32>,
    %113 = arith.truncf %110 : vector<2x8x8xf32> to vector<2x8x8xbf16>
    %114 = arith.truncf %97 : vector<2x8x8xf32> to vector<2x8x8xbf16>
    "tpu.trace_start"() <{level = 10 : i32, message = "bqk,bkd->bqd"}> : () -> ()
    %cst_40 = arith.constant dense<0.000000e+00> : vector<2x8x8xf32>
    %115 = tpu.matmul %113, %114, %cst_40 {dimension_numbers = #tpu.dot_dimension_numbers<[2], [1], [1], [2], [0, 0, 0, 1, 1, 2], [0], [0]>} : vector<2x8x8xbf16>, vector<2x8x8xbf16>, vector<2x8x8xf32> -> vector<2x8x8xf32>
    "tpu.trace_stop"() : () -> ()
    %116 = vector.shape_cast %115 : vector<2x8x8xf32> to vector<16x8xf32>
    %c0_41 = arith.constant 0 : index
    %c24_42 = arith.constant 24 : index
    %117 = vector.load %arg12[%c0_41, %c24_42] : memref<16x32xf32, #tpu.memory_space<vmem>>, vector<16x8xf32>
    tpu.vector_store %arg12[%c0_41, %c24_42], %116 {strides = array<i32>} : memref<16x32xf32, #tpu.memory_space<vmem>>, vector<16x8xf32>,
    %c0_43 = arith.constant 0 : index
    %c0_44 = arith.constant 0 : index
    %118 = vector.load %arg12[%c0_43, %c0_44] : memref<16x32xf32, #tpu.memory_space<vmem>>, vector<16x32xf32>
    %119 = arith.truncf %118 : vector<16x32xf32> to vector<16x32xbf16>
    %c0_45 = arith.constant 0 : index
    %c0_46 = arith.constant 0 : index
    %120 = vector.load %arg7[%c0_45, %c0_46] : memref<32x32xbf16, #tpu.memory_space<vmem>>, vector<32x32xbf16>
    %cst_47 = arith.constant dense<0.000000e+00> : vector<16x32xf32>
    %121 = tpu.matmul %119, %120, %cst_47 {dimension_numbers = #tpu.dot_dimension_numbers<[1], [0], [0], [1], [0, 0, 1, 1], [], []>} : vector<16x32xbf16>, vector<32x32xbf16>, vector<16x32xf32> -> vector<16x32xf32>
    %122 = arith.addf %121, %0 : vector<16x32xf32>
    %cst_48 = arith.constant dense<0.000000e+00> : vector<16xf32>
    %123 = vector.multi_reduction <add>, %122, %cst_48 [1] : vector<16x32xf32> to vector<16xf32>
    %124 = vector.shape_cast %123 : vector<16xf32> to vector<16x1xf32>
    %cst_49 = arith.constant 3.200000e+01 : f32
    %125 = vector.broadcast %cst_49 : f32 to vector<16x1xf32>
    %126 = arith.divf %124, %125 : vector<16x1xf32>
    %127 = vector.broadcast %126 : vector<16x1xf32> to vector<16x32xf32>
    %128 = arith.subf %122, %127 : vector<16x32xf32>
    %129 = arith.mulf %128, %128 : vector<16x32xf32>
    %cst_50 = arith.constant dense<0.000000e+00> : vector<16xf32>
    %130 = vector.multi_reduction <add>, %129, %cst_50 [1] : vector<16x32xf32> to vector<16xf32>
    %131 = vector.shape_cast %130 : vector<16xf32> to vector<16x1xf32>
    %cst_51 = arith.constant 3.200000e+01 : f32
    %132 = vector.broadcast %cst_51 : f32 to vector<16x1xf32>
    %133 = arith.divf %131, %132 : vector<16x1xf32>
    %cst_52 = arith.constant 9.99999997E-7 : f32
    %134 = vector.broadcast %cst_52 : f32 to vector<16x1xf32>
    %135 = arith.addf %133, %134 : vector<16x1xf32>
    %136 = math.rsqrt %135 : vector<16x1xf32>
    %137 = vector.broadcast %136 : vector<16x1xf32> to vector<16x32xf32>
    %138 = arith.mulf %128, %137 : vector<16x32xf32>
    %c0_53 = arith.constant 0 : index
    %c0_54 = arith.constant 0 : index
    %139 = vector.load %arg8[%c0_53, %c0_54] : memref<1x32xf32, #tpu.memory_space<vmem>>, vector<1x32xf32>
    %140 = vector.broadcast %139 : vector<1x32xf32> to vector<16x32xf32>
    %141 = arith.mulf %138, %140 : vector<16x32xf32>
    %c0_55 = arith.constant 0 : index
    %c0_56 = arith.constant 0 : index
    %142 = vector.load %arg9[%c0_55, %c0_56] : memref<1x32xf32, #tpu.memory_space<vmem>>, vector<1x32xf32>
    %143 = vector.broadcast %142 : vector<1x32xf32> to vector<16x32xf32>
    %144 = arith.addf %141, %143 : vector<16x32xf32>
    %c0_57 = arith.constant 0 : index
    %c0_58 = arith.constant 0 : index
    %145 = vector.load %arg10[%c0_57, %c0_58] : memref<16x32xf32, #tpu.memory_space<vmem>>, vector<16x32xf32>
    tpu.vector_store %arg10[%c0_57, %c0_58], %144 {strides = array<i32>} : memref<16x32xf32, #tpu.memory_space<vmem>>, vector<16x32xf32>,
    return
  }
  func.func @transform_0(%arg0: i32) -> (i32, i32) {
    %c0_i32 = arith.constant 0 : i32
    %c0_i32_0 = arith.constant 0 : i32
    return %arg0, %c0_i32 : i32, i32
  }
  func.func @transform_1(%arg0: i32) -> (i32, i32) {
    %c0_i32 = arith.constant 0 : i32
    %c0_i32_0 = arith.constant 0 : i32
    return %arg0, %c0_i32 : i32, i32
  }
  func.func @transform_2(%arg0: i32) -> (i32, i32) {
    %c0_i32 = arith.constant 0 : i32
    %c0_i32_0 = arith.constant 0 : i32
    return %arg0, %c0_i32 : i32, i32
  }
  func.func @transform_3(%arg0: i32) -> (i32, i32) {
    %c0_i32 = arith.constant 0 : i32
    %c0_i32_0 = arith.constant 0 : i32
    %c0_i32_1 = arith.constant 0 : i32
    return %c0_i32, %c0_i32_0 : i32, i32
  }
  func.func @transform_4(%arg0: i32) -> (i32, i32) {
    %c0_i32 = arith.constant 0 : i32
    %c0_i32_0 = arith.constant 0 : i32
    %c0_i32_1 = arith.constant 0 : i32
    return %c0_i32, %c0_i32_0 : i32, i32
  }
  func.func @transform_5(%arg0: i32) -> (i32, i32) {
    %c0_i32 = arith.constant 0 : i32
    %c0_i32_0 = arith.constant 0 : i32
    %c0_i32_1 = arith.constant 0 : i32
    return %c0_i32, %c0_i32_0 : i32, i32
  }
  func.func @transform_6(%arg0: i32) -> (i32, i32) {
    %c0_i32 = arith.constant 0 : i32
    %c0_i32_0 = arith.constant 0 : i32
    %c0_i32_1 = arith.constant 0 : i32
    return %c0_i32, %c0_i32_0 : i32, i32
  }
  func.func @transform_7(%arg0: i32) -> (i32, i32) {
    %c0_i32 = arith.constant 0 : i32
    %c0_i32_0 = arith.constant 0 : i32
    %c0_i32_1 = arith.constant 0 : i32
    return %c0_i32, %c0_i32_0 : i32, i32
  }
  func.func @transform_8(%arg0: i32) -> (i32, i32) {
    %c0_i32 = arith.constant 0 : i32
    %c0_i32_0 = arith.constant 0 : i32
    %c0_i32_1 = arith.constant 0 : i32
    return %c0_i32, %c0_i32_0 : i32, i32
  }
  func.func @transform_9(%arg0: i32) -> (i32, i32) {
    %c0_i32 = arith.constant 0 : i32
    %c0_i32_0 = arith.constant 0 : i32
    return %arg0, %c0_i32 : i32, i32
  }
  func.func @transform_10(%arg0: i32) -> (i32, i32) {
    %c0_i32 = arith.constant 0 : i32
    %c0_i32_0 = arith.constant 0 : i32
    return %arg0, %c0_i32 : i32, i32
  }
}

</mosaic_0001>

<bundles_post_ra>
// kernel: tpu_custom_call.1
= control target key start
LH: loop header
LB: loop body
LE: loop exit
PB: predicated region body
PF: predicated region fallthrough
CT: control target
= control target key end

     0   :  { %16 = vsyncpa [#allocation4], 0  ;;  %s1562_s0 = inlined_call_operand.hbm [shape: f32[16,32], index: 0, kind: input, shape index: {}]   ;;  %s1563_s1 = inlined_call_operand.hbm [shape: f32[16,32], index: 1, kind: input, shape index: {}]   ;;  %s1564_s2 = inlined_call_operand.hbm [shape: f32[16,32], index: 2, kind: input, shape index: {}]   ;;  %s1565_s3 = inlined_call_operand.hbm [shape: bf16[32,32], index: 3, kind: input, shape index: {}]   ;;  %s1566_s4 = inlined_call_operand.hbm [shape: bf16[32,32], index: 4, kind: input, shape index: {}]   ;;  %s1567_s5 = inlined_call_operand.hbm [shape: bf16[32,32], index: 5, kind: input, shape index: {}]   ;;  %s1568_s6 = inlined_call_operand.hbm [shape: bf16[32,32], index: 6, kind: input, shape index: {}]   ;;  %s1569_s7 = inlined_call_operand.vmem [shape: f32[1,32], index: 7, kind: input, shape index: {}]   ;;  %s1570_s8 = inlined_call_operand.vmem [shape: f32[1,32], index: 8, kind: input, shape index: {}]   ;;  %s1571_s9 = inlined_call_operand.hbm [shape: f32[16,32], index: 9, kind: output, shape index: {0}]   ;;  %s1572_s10 = inlined_call_operand.hbm [shape: f32[16,32], index: 10, kind: output, shape index: {1}]  }
   0x1   :  { %17 = vsyncpa [#allocation7], 0 }
   0x2   :  { %18 = vsyncpa [#allocation10], 0 }
   0x3   :  { %19 = vsyncpa [#allocation13], 0 }
   0x4   :  { %20 = vsyncpa [#allocation5], 0 }
   0x5   :  { %21 = vsyncpa [#allocation17], 0  ;;  %s39_s15 = sshll.u32 %s1563_s1, 4  ;;  %s1274_s16 = smov [#allocation6]   ;;  %s40_s15 = int_to_ptr.hbm [resolvable:$true] %s39_s15 }
   0x6   :  { %s41_s17 = sshll.u32 %s1274_s16, 4  ;;  %s65_s20 = sshll.u32 %s1565_s3, 4  ;;  %s42_s17 = int_to_ptr.vmem [resolvable:$true] %s41_s17  ;;  %s66_s20 = int_to_ptr.hbm [resolvable:$true] %s65_s20 }
   0x7   :  { %s1275_s21 = smov 128   ;;  %s1276_s22 = smov 8  }
   0x8   :  { %47 = dma.hbm_to_vmem [thread:$0]  %s40_s15, 256, %s42_s17, [#allocation7], %s1275_s21, %s1275_s21, %s1276_s22  }
   0x9   :  { %s1277_s23 = smov [#allocation9]   ;;  %s1278_s25 = smov 64  }
   0xa   :  { %s67_s24 = sshll.u32 %s1277_s23, 4  ;;  %s1279_s1 = smov 4   ;;  %s68_s24 = int_to_ptr.vmem [resolvable:$true] %s67_s24 }
   0xb   :  { %73 = dma.hbm_to_vmem [thread:$0]  %s66_s20, 256, %s68_s24, [#allocation10], %s1278_s25, %s1278_s25, %s1279_s1  }
   0xc   :  { %s91_s3 = sshll.u32 %s1567_s5, 4  ;;  %s1280_s28 = smov [#allocation12]   ;;  %s92_s3 = int_to_ptr.hbm [resolvable:$true] %s91_s3 }
   0xd   :  { %s93_s29 = sshll.u32 %s1280_s28, 4  ;;  %s26_s12 = sshll.u32 %s1562_s0, 4  ;;  %s94_s29 = int_to_ptr.vmem [resolvable:$true] %s93_s29  ;;  %s27_s12 = int_to_ptr.hbm [resolvable:$true] %s26_s12 }
   0xe   :  { %99 = dma.hbm_to_vmem [thread:$0]  %s92_s3, 256, %s94_s29, [#allocation13], %s1278_s25, %s1278_s25, %s1279_s1  }
   0xf   :  { %s1281_s13 = smov [#allocation3]   ;;  %s52_s17 = sshll.u32 %s1564_s2, 4  ;;  %s53_s17 = int_to_ptr.hbm [resolvable:$true] %s52_s17 }
  0x10   :  { %s28_s14 = sshll.u32 %s1281_s13, 4  ;;  %s78_s0 = sshll.u32 %s1566_s4, 4  ;;  %s29_s14 = int_to_ptr.vmem [resolvable:$true] %s28_s14  ;;  %s79_s0 = int_to_ptr.hbm [resolvable:$true] %s78_s0 }
  0x11   :  { %34 = dma.hbm_to_vmem [thread:$0]  %s27_s12, 256, %s29_s14, [#allocation4], %s1275_s21, %s1275_s21, %s1276_s22  }
  0x12   :  { %s1282_s19 = smov [#allocation8]   ;;  %s1283_s23 = smov [#allocation11]  }
  0x13   :  { %s54_s20 = sshll.u32 %s1282_s19, 4  ;;  %s80_s2 = sshll.u32 %s1283_s23, 4  ;;  %s55_s20 = int_to_ptr.vmem [resolvable:$true] %s54_s20  ;;  %s81_s2 = int_to_ptr.vmem [resolvable:$true] %s80_s2 }
  0x14   :  { %60 = dma.hbm_to_vmem [thread:$0]  %s53_s17, 256, %s55_s20, [#allocation7], %s1275_s21, %s1275_s21, %s1276_s22  }
  0x15   :  { %s104_s27 = sshll.u32 %s1568_s6, 4  ;;  %s1284_s4 = smov [#allocation14]   ;;  %s105_s27 = int_to_ptr.hbm [resolvable:$true] %s104_s27 }
  0x16   :  { %86 = dma.hbm_to_vmem [thread:$0]  %s79_s0, 256, %s81_s2, [#allocation10], %s1278_s25, %s1278_s25, %s1279_s1  }
  0x17   :  { %s106_s3 = sshll.u32 %s1284_s4, 4  ;;  %s107_s3 = int_to_ptr.vmem [resolvable:$true] %s106_s3 }
  0x18   :  { %112 = dma.hbm_to_vmem [thread:$0]  %s105_s27, 256, %s107_s3, [#allocation13], %s1278_s25, %s1278_s25, %s1279_s1  }
  0x19   :  { %1262 = dma.done.wait [#allocation4], 256  }
  0x1a   :  { %1263 = vsyncadd [#allocation4], 4294967040 }
  0x1b   :  { %1264 = dma.done.wait [#allocation7], 512  }
  0x1c   :  { %1265 = vsyncadd [#allocation7], 4294966784 }
  0x1d   :  { %1266 = dma.done.wait [#allocation10], 512  }
  0x1e   :  { %1267 = vsyncadd [#allocation10], 4294966784 }
  0x1f   :  { %1268 = dma.done.wait [#allocation13], 512  }
  0x20   :  { %1269 = vsyncadd [#allocation13], 4294966784  ;;  %v980_v0 = vld [vmem:[#allocation9 + $0x8] sm:$0xff]  ;;  %v982_v1 = vld [vmem:[#allocation11 + $0x8] sm:$0xff]  ;;  %vm169_vm0 = vcmask 261120   ;;  %vm261_vm1 = vcmask 64512  }
  0x21   :  { %v979_v2 = vld [vmem:[#allocation9] sm:$0xff]  ;;  %v981_v3 = vld [vmem:[#allocation11] sm:$0xff]  ;;  %v1392_v5 = vld [vmem:[#allocation3 + $0x8] sm:$0xff]  ;;  %179 = vmatpush.bf16.msra.mxu0 %v980_v0  ;;  %213 = vmatpush.bf16.msra.mxu1 %v982_v1  ;;  %s1285_s6 = smov 112   ;;  %s1286_s25 = smov 120   ;;  %vm331_vm2 = vcmask 1043456  }
  0x22   :  { %v1390_v4 = vld [vmem:[#allocation3] sm:$0xff]  ;;  %v148_v6 = vld [vmem:[#allocation6] sm:$0xff]  ;;  %v149_v7 = vld [vmem:[#allocation6 + $0x8] sm:$0xff]  ;;  %s1287_s1 = smov 104   ;;  %s1288_s28 = smov 16   ;;  %vm457_vm3 = vcmask 130112  }
  0x23   :  { %v152_v8 = vpack.c.bf16 %v1392_v5, %v1390_v4  ;;  %v187_v9 = vpack.c.bf16 %v149_v7, %v148_v6  ;;  %v984_v43 = vld [vmem:[#allocation12 + $0x8] sm:$0xff]  ;;  %v983_v44 = vld [vmem:[#allocation12] sm:$0xff]  ;;  %v150_v45 = vld [vmem:[#allocation8] sm:$0xff]  ;;  %s1289_s29 = smov 24   ;;  %vm596_vm4 = vcmask 195712   ;;  %vm729_vm5 = vcmask 261312  }
  0x24   :  { %247 = vmatpush.bf16.msra.mxu2 %v984_v43  ;;  %v151_v46 = vld [vmem:[#allocation8 + $0x8] sm:$0xff]  ;;  %s1291_s14 = smov [#allocation16]   ;;  %s906_s5 = sshll.u32 %s1572_s10, 4  ;;  %s907_s5 = int_to_ptr.hbm [resolvable:$true] %s906_s5 }
  0x25   :  { %180 = vmatpush.bf16.msra.mxu0 %v979_v2  ;;  %214 = vmatpush.bf16.msra.mxu1 %v981_v3  ;;  %v221_v49 = vpack.c.bf16 %v151_v46, %v150_v45  ;;  %s904_s15 = sshll.u32 %s1291_s14, 4  ;;  %s893_s0 = sshll.u32 %s1571_s9, 4  ;;  %s905_s15 = int_to_ptr.vmem [resolvable:$true] %s904_s15  ;;  %s894_s0 = int_to_ptr.hbm [resolvable:$true] %s893_s0 }
  0x28   :  { %935 = vmatmul.msk.bf16.vlgmr.msra.gmra.mxu0 %vm169_vm0, %v152_v8  ;;  %944 = vmatmul.msk.bf16.vlgmr.msra.gmra.mxu1 %vm169_vm0, %v187_v9 }
  0x29   :  { %248 = vmatpush.bf16.msra.mxu2 %v983_v44 }
  0x2c   :  { %953 = vmatmul.msk.bf16.vlgmr.msra.gmra.mxu2 %vm169_vm0, %v221_v49 }
  0xa5   :  { %v182_v10 = vpop.f32.mrf.mxu0  ;;  %v216_v11 = vpop.f32.mrf.mxu1 }
  0xa6   :  { %v255_v12 = vmul.f32 0.35355338, %v182_v10  ;;  %v259_v13 = vpack.c.bf16 %v216_v11, %v216_v11 }
  0xa8   :  { %v257_v14 = vpack.c.bf16 %v255_v12, %v255_v12  ;;  %v375_v15 = vunpack.c.l.b16 %v259_v13  ;;  %v266_v16 = vsel %vm261_vm1, %v259_v13, 0 }
  0xa9   :  { %275 = vmatpush.bf16.xpose.msra.mxu3 %v266_v16 }
  0xaa   :  { %v370_v17 = vunpack.c.l.b16 %v257_v14  ;;  %v376_v18 = vpack.c.b16 %v375_v15, %v375_v15 }
  0xac   :  { %v371_v19 = vpack.c.b16 %v370_v17, %v370_v17  ;;  %522 = vrot.lane.b32.xlu2 %v376_v18, %s1285_s6  ;;  %377 = vrot.lane.b32.xlu0 %v376_v18, %s1286_s25 }
  0xad   :  { %v184_v20 = vpop.f32.mrf.mxu0  ;;  %v218_v21 = vpop.f32.mrf.mxu1 }
  0xae   :  { %v256_v22 = vmul.f32 0.35355338, %v184_v20  ;;  %v260_v23 = vpack.c.bf16 %v218_v21, %v218_v21  ;;  %372 = vrot.lane.b32.xlu1 %v371_v19, %s1286_s25 }
  0xb0   :  { %v258_v24 = vpack.c.bf16 %v256_v22, %v256_v22  ;;  %v404_v25 = vunpack.c.l.b16 %v260_v23  ;;  %954 = vmatmul.msk.bf16.vlgmr.msra.gmra.mxu3 %vm261_vm1, %v257_v14  ;;  %v285_v26 = vsel %vm261_vm1, %v260_v23, 0  ;;  %v250_v14 = vpop.f32.mrf.mxu2 }
  0xb1   :  { %294 = vmatpush.bf16.xpose.msrb.mxu0 %v285_v26  ;;  %v326_v16 = vpack.c.bf16 %v250_v14, %v250_v14 }
  0xb2   :  { %v399_v27 = vunpack.c.l.b16 %v258_v24  ;;  %v405_v28 = vpack.c.b16 %v404_v25, %v404_v25 }
  0xb4   :  { %v400_v29 = vpack.c.b16 %v399_v27, %v399_v27  ;;  %545 = vrot.lane.b32.xlu2 %v405_v28, %s1285_s6  ;;  %406 = vrot.lane.b32.xlu0 %v405_v28, %s1286_s25  ;;  %v463_v27 = vunpack.c.l.b16 %v326_v16 }
  0xb6   :  { %401 = vrot.lane.b32.xlu1 %v400_v29, %s1286_s25 }
  0xb8   :  { %955 = vmatmul.msk.bf16.vlgmr.msrb.gmra.mxu0 %vm261_vm1, %v258_v24  ;;  %v252_v21 = vpop.f32.mrf.mxu2 }
  0xb9   :  { %v327_v23 = vpack.c.bf16 %v252_v21, %v252_v21 }
  0xbb   :  { %v352_v24 = vsel %vm331_vm2, %v327_v23, 0 }
  0xbc   :  { %655 = vrot.lane.b32.xlu2 %v376_v18, %s1287_s1  ;;  %520 = vrot.lane.b32.xlu0 %v371_v19, %s1285_s6 }
  0xbd   :  { %361 = vmatpush.bf16.msrb.mxu2 %v352_v24 }
  0xbe   :  { %543 = vrot.lane.b32.xlu1 %v400_v29, %s1285_s6 }
  0xc4   :  { %678 = vrot.lane.b32.xlu0 %v405_v28, %s1287_s1  ;;  %676 = vrot.lane.b32.xlu2 %v400_v29, %s1287_s1 }
  0xc6   :  { %653 = vrot.lane.b32.xlu1 %v371_v19, %s1287_s1  ;;  %v333_v19 = vsel %vm331_vm2, %v326_v16, 0 }
  0xc7   :  { %342 = vmatpush.bf16.msrb.mxu1 %v333_v19 }
 0x106   :  { %v523_v30 = vpop.permute.xlu2 %522 }
 0x107   :  { %v528_v34 = vsel %vm261_vm1, %v523_v30, 0  ;;  %v1445_v30 = vpack.c.b16 %v463_v27, %v463_v27 }
 0x10e   :  { %v546_v31 = vpop.permute.xlu2 %545 }
 0x10f   :  { %v551_v40 = vsel %vm261_vm1, %v546_v31, 0 }
 0x116   :  { %v656_v35 = vpop.permute.xlu2 %655 }
 0x117   :  { %v661_v38 = vsel %vm261_vm1, %v656_v35, 0 }
 0x11e   :  { %v378_v32 = vpop.permute.xlu0 %377  ;;  %v677_v58 = vpop.permute.xlu2 %676 }
 0x11f   :  { %v383_v33 = vsel %vm261_vm1, %v378_v32, 0 }
 0x120   :  { %392 = vmatpush.bf16.xpose.msrb.mxu3 %v383_v33  ;;  %v373_v36 = vpop.permute.xlu1 %372  ;;  %v487_v33 = vunpack.c.l.b16 %v327_v23 }
 0x126   :  { %v407_v37 = vpop.permute.xlu0 %406 }
 0x127   :  { %v412_v39 = vsel %vm261_vm1, %v407_v37, 0  ;;  %958 = vmatmul.msk.bf16.vlgmr.msrb.gmra.mxu3 %vm261_vm1, %v373_v36 }
 0x128   :  { %537 = vmatpush.bf16.xpose.msra.mxu3 %v528_v34  ;;  %421 = vmatpush.bf16.xpose.msra.mxu0 %v412_v39  ;;  %v402_v41 = vpop.permute.xlu1 %401  ;;  %v1449_v34 = vpack.c.b16 %v487_v33, %v487_v33 }
 0x12e   :  { %v521_v42 = vpop.permute.xlu0 %520 }
 0x12f   :  { %959 = vmatmul.msk.bf16.vlgmr.msra.gmra.mxu0 %vm261_vm1, %v402_v41 }
 0x130   :  { %670 = vmatpush.bf16.xpose.msrb.mxu3 %v661_v38  ;;  %560 = vmatpush.bf16.xpose.msrb.mxu0 %v551_v40  ;;  %v544_v55 = vpop.permute.xlu1 %543 }
 0x133   :  { %v277_v47 = vpop.f32.mrf.mxu3 }
 0x134   :  { %v300_v48 = vsel %vm261_vm1, %v277_v47, -inf }
 0x135   :  { %301 = vmax.xlane.f32.xlu1 %v300_v48  ;;  %v296_v50 = vpop.f32.mrf.mxu0 }
 0x136   :  { %v679_v51 = vpop.permute.xlu0 %678  ;;  %v303_v52 = vsel %vm261_vm1, %v296_v50, -inf }
 0x137   :  { %v684_v53 = vsel %vm261_vm1, %v679_v51, 0  ;;  %962 = vmatmul.msk.bf16.vlgmr.msra.gmra.mxu3 %vm261_vm1, %v521_v42  ;;  %304 = vmax.xlane.f32.xlu0 %v303_v52 }
 0x138   :  { %693 = vmatpush.bf16.xpose.msra.mxu0 %v684_v53  ;;  %v654_v57 = vpop.permute.xlu1 %653 }
 0x13b   :  { %v279_v54 = vpop.f32.mrf.mxu3 }
 0x13d   :  { %v298_v56 = vpop.f32.mrf.mxu0 }
 0x13f   :  { %963 = vmatmul.msk.bf16.vlgmr.msrb.gmra.mxu0 %vm261_vm1, %v544_v55 }
 0x147   :  { %966 = vmatmul.msk.bf16.vlgmr.msrb.gmra.mxu3 %vm261_vm1, %v654_v57 }
 0x14f   :  { %967 = vmatmul.msk.bf16.vlgmr.msra.gmra.mxu0 %vm261_vm1, %v677_v58 }
 0x1a8   :  { %v302_v59 = vpop.xlane.xlu1 %301 }
 0x1a9   :  { %v306_v63 = vsub.f32 %v277_v47, %v302_v59 }
 0x1aa   :  { %v394_v60 = vpop.f32.mrf.mxu3  ;;  %v305_v61 = vpop.xlane.xlu0 %304 }
 0x1ab   :  { %v307_v62 = vsub.f32 %v296_v50, %v305_v61  ;;  %v308_v3 = vmul.f32 1.442695, %v306_v63  ;;  %v427_v9 = vsel %vm261_vm1, %v394_v60, -inf }
 0x1ac   :  { %v423_v0 = vpop.f32.mrf.mxu0 }
 0x1ad   :  { %v310_v1 = vmul.f32 1.442695, %v307_v62  ;;  %v430_v2 = vsel %vm261_vm1, %v423_v0, -inf }
 0x1ae   :  { %431 = vmax.xlane.f32.xlu2 %v430_v2 }
 0x1af   :  { %1008 = vpow2.f32 %v310_v1 }
 0x1b0   :  { %1010 = vpow2.f32 %v308_v3 }
 0x1b2   :  { %v396_v6 = vpop.f32.mrf.mxu3 }
 0x1b4   :  { %v425_v7 = vpop.f32.mrf.mxu0 }
 0x1b5   :  { %v1009_v8 = vpop.eup %1008 }
 0x1b6   :  { %428 = vmax.xlane.f32.xlu2 %v427_v9  ;;  %v315_v10 = vsel %vm261_vm1, %v1009_v8, 0.0  ;;  %v1432_v11 = vpop.eup %1010 }
 0x1b7   :  { %316 = vadd.xlane.f32.xlu0 %v315_v10  ;;  %v312_v17 = vsel %vm261_vm1, %v1432_v11, 0.0 }
 0x1ba   :  { %v539_v12 = vpop.f32.mrf.mxu3 }
 0x1bb   :  { %v566_v13 = vsel %vm261_vm1, %v539_v12, -inf }
 0x1bc   :  { %567 = vmax.xlane.f32.xlu1 %v566_v13  ;;  %v562_v15 = vpop.f32.mrf.mxu0 }
 0x1bd   :  { %v569_v18 = vsel %vm261_vm1, %v562_v15, -inf }
 0x1be   :  { %313 = vadd.xlane.f32.xlu2 %v312_v17 }
 0x1bf   :  { %570 = vmax.xlane.f32.xlu0 %v569_v18 }
 0x1c2   :  { %v541_v20 = vpop.f32.mrf.mxu3 }
 0x1c4   :  { %v564_v22 = vpop.f32.mrf.mxu0 }
 0x1ca   :  { %v1440_v25 = vpop.f32.mrf.mxu3 }
 0x1cb   :  { %v699_v26 = vsel %vm261_vm1, %v1440_v25, -inf }
 0x1cc   :  { %700 = vmax.xlane.f32.xlu1 %v699_v26  ;;  %v695_v28 = vpop.f32.mrf.mxu0 }
 0x1cd   :  { %v702_v29 = vsel %vm261_vm1, %v695_v28, -inf }
 0x1ce   :  { %703 = vmax.xlane.f32.xlu2 %v702_v29 }
 0x1d2   :  { %v674_v31 = vpop.f32.mrf.mxu3 }
 0x1d3   :  { %465 = vrot.lane.b32.xlu0 %v1445_v30, %s1286_s25 }
 0x1d4   :  { %v697_v32 = vpop.f32.mrf.mxu0 }
 0x1e5   :  { %622 = vrot.lane.b32.xlu1 %v1449_v34, %s1285_s6 }
 0x1e6   :  { %489 = vrot.lane.b32.xlu2 %v1449_v34, %s1286_s25 }
 0x221   :  { %v432_v35 = vpop.xlane.xlu2 %431 }
 0x222   :  { %v434_v36 = vsub.f32 %v423_v0, %v432_v35 }
 0x224   :  { %v437_v37 = vmul.f32 1.442695, %v434_v36 }
 0x226   :  { %1012 = vpow2.f32 %v437_v37 }
 0x229   :  { %v429_v38 = vpop.xlane.xlu2 %428 }
 0x22a   :  { %v433_v39 = vsub.f32 %v394_v60, %v429_v38  ;;  %v317_v40 = vpop.xlane.xlu0 %316 }
 0x22b   :  { %1014 = vrcp.f32 %v317_v40 }
 0x22c   :  { %v1455_v41 = vpop.eup %1012  ;;  %v435_v42 = vmul.f32 1.442695, %v433_v39 }
 0x22d   :  { %v442_v43 = vsel %vm261_vm1, %v1455_v41, 0.0 }
 0x22e   :  { %1016 = vpow2.f32 %v435_v42  ;;  %443 = vadd.xlane.f32.xlu0 %v442_v43 }
 0x22f   :  { %v568_v44 = vpop.xlane.xlu1 %567 }
 0x230   :  { %v572_v45 = vsub.f32 %v539_v12, %v568_v44 }
 0x231   :  { %v1015_v46 = vpop.eup %1014  ;;  %v314_v47 = vpop.xlane.xlu2 %313 }
 0x232   :  { %v321_v48 = vmul.f32 %v1015_v46, %v1009_v8  ;;  %v574_v49 = vmul.f32 1.442695, %v572_v45  ;;  %1018 = vrcp.f32 %v314_v47  ;;  %v571_v50 = vpop.xlane.xlu0 %570 }
 0x233   :  { %v573_v52 = vsub.f32 %v562_v15, %v571_v50 }
 0x234   :  { %v1017_v51 = vpop.eup %1016  ;;  %323 = vst.msk [vmem:[#allocation16 + $0x8] sm:$0xff] %vm261_vm1, %v321_v48  ;;  %1020 = vpow2.f32 %v574_v49  ;;  %v325_v53 = vpack.c.bf16 %v321_v48, %v321_v48 }
 0x235   :  { %v439_v54 = vsel %vm261_vm1, %v1017_v51, 0.0  ;;  %v576_v56 = vmul.f32 1.442695, %v573_v52 }
 0x236   :  { %957 = vmatmul.msk.bf16.vlgmr.msrb.gmra.mxu2 %vm261_vm1, %v325_v53  ;;  %440 = vadd.xlane.f32.xlu1 %v439_v54 }
 0x237   :  { %1022 = vpow2.f32 %v576_v56 }
 0x238   :  { %v1019_v55 = vpop.eup %1018 }
 0x239   :  { %v320_v57 = vmul.f32 %v1019_v55, %v1432_v11 }
 0x23a   :  { %v1021_v58 = vpop.eup %1020 }
 0x23b   :  { %322 = vst.msk [vmem:[#allocation16] sm:$0xff] %vm261_vm1, %v320_v57  ;;  %v324_v59 = vpack.c.bf16 %v320_v57, %v320_v57  ;;  %v578_v60 = vsel %vm261_vm1, %v1021_v58, 0.0 }
 0x23d   :  { %956 = vmatmul.msk.bf16.vlgmr.msrb.gmra.mxu1 %vm261_vm1, %v324_v59  ;;  %v1023_v62 = vpop.eup %1022 }
 0x23e   :  { %579 = vadd.xlane.f32.xlu1 %v578_v60  ;;  %v581_v1 = vsel %vm261_vm1, %v1023_v62, 0.0 }
 0x23f   :  { %v701_v10 = vpop.xlane.xlu1 %700 }
 0x240   :  { %v705_v13 = vsub.f32 %v1440_v25, %v701_v10 }
 0x241   :  { %v704_v61 = vpop.xlane.xlu2 %703 }
 0x242   :  { %v706_v63 = vsub.f32 %v695_v28, %v704_v61  ;;  %601 = vrot.lane.b32.xlu0 %v1445_v30, %s1285_s6  ;;  %v707_v14 = vmul.f32 1.442695, %v705_v13 }
 0x244   :  { %v709_v0 = vmul.f32 1.442695, %v706_v63 }
 0x245   :  { %v466_v7 = vpop.permute.xlu0 %465 }
 0x246   :  { %1024 = vpow2.f32 %v709_v0  ;;  %582 = vadd.xlane.f32.xlu1 %v581_v1  ;;  %v471_v9 = vsel %vm331_vm2, %v466_v7, 0  ;;  %v985_v7 = vld [vmem:[#allocation14] sm:$0xff] }
 0x247   :  { %480 = vmatpush.bf16.msra.mxu1 %v471_v9  ;;  %1026 = vpow2.f32 %v707_v14 }
 0x249   :  { %v490_v2 = vpop.permute.xlu2 %489 }
 0x24a   :  { %v495_v3 = vsel %vm331_vm2, %v490_v2, 0 }
 0x24b   :  { %504 = vmatpush.bf16.msra.mxu2 %v495_v3 }
 0x24c   :  { %v1025_v6 = vpop.eup %1024 }
 0x24d   :  { %v714_v8 = vsel %vm261_vm1, %v1025_v6, 0.0  ;;  %v1027_v15 = vpop.eup %1026 }
 0x24e   :  { %715 = vadd.xlane.f32.xlu2 %v714_v8  ;;  %v711_v16 = vsel %vm261_vm1, %v1027_v15, 0.0 }
 0x257   :  { %v623_v11 = vpop.permute.xlu1 %622 }
 0x258   :  { %v628_v12 = vsel %vm331_vm2, %v623_v11, 0 }
 0x259   :  { %637 = vmatpush.bf16.msrb.mxu2 %v628_v12 }
 0x25f   :  { %755 = vrot.lane.b32.xlu1 %v1449_v34, %s1287_s1 }
 0x267   :  { %734 = vrot.lane.b32.xlu1 %v1445_v30, %s1287_s1 }
 0x26c   :  { %712 = vadd.xlane.f32.xlu0 %v711_v16 }
 0x2a1   :  { %v444_v17 = vpop.xlane.xlu0 %443 }
 0x2a2   :  { %1028 = vrcp.f32 %v444_v17 }
 0x2a8   :  { %v1029_v18 = vpop.eup %1028 }
 0x2a9   :  { %v448_v19 = vmul.f32 %v1029_v18, %v1455_v41  ;;  %v441_v20 = vpop.xlane.xlu1 %440 }
 0x2aa   :  { %1030 = vrcp.f32 %v441_v20 }
 0x2ab   :  { %v461_v21 = vpack.c.bf16 %v448_v19, %v448_v19 }
 0x2ad   :  { %961 = vmatmul.msk.bf16.vlgmr.msra.gmra.mxu2 %vm261_vm1, %v461_v21 }
 0x2b0   :  { %v1031_v22 = vpop.eup %1030 }
 0x2b1   :  { %v1481_v23 = vmul.f32 %v1031_v22, %v1017_v51  ;;  %v580_v24 = vpop.xlane.xlu1 %579 }
 0x2b2   :  { %1032 = vrcp.f32 %v580_v24 }
 0x2b3   :  { %v460_v25 = vpack.c.bf16 %v1481_v23, %v1481_v23 }
 0x2b4   :  { %v602_v26 = vpop.permute.xlu0 %601 }
 0x2b5   :  { %v607_v27 = vsel %vm331_vm2, %v602_v26, 0  ;;  %960 = vmatmul.msk.bf16.vlgmr.msra.gmra.mxu1 %vm261_vm1, %v460_v25 }
 0x2b6   :  { %616 = vmatpush.bf16.msrb.mxu1 %v607_v27 }
 0x2b8   :  { %v1033_v31 = vpop.eup %1032 }
 0x2b9   :  { %v363_v28 = vpop.f32.mrf.mxu2  ;;  %v583_v29 = vpop.xlane.xlu1 %582  ;;  %v1489_v32 = vmul.f32 %v1033_v31, %v1021_v58 }
 0x2ba   :  { %368 = vst.msk [vmem:[#allocation2 + $0x8] sm:$0xff] %vm261_vm1, %v363_v28  ;;  %1034 = vrcp.f32 %v583_v29  ;;  %v344_v30 = vpop.f32.mrf.mxu1 }
 0x2bb   :  { %367 = vst.msk [vmem:[#allocation2] sm:$0xff] %vm261_vm1, %v344_v30  ;;  %v599_v37 = vpack.c.bf16 %v1489_v32, %v1489_v32 }
 0x2c0   :  { %v1035_v33 = vpop.eup %1034 }
 0x2c1   :  { %v1491_v34 = vmul.f32 %v1035_v33, %v1023_v62  ;;  %v365_v35 = vpop.f32.mrf.mxu2  ;;  %v716_v39 = vpop.xlane.xlu2 %715 }
 0x2c2   :  { %v346_v36 = vpop.f32.mrf.mxu1  ;;  %1036 = vrcp.f32 %v716_v39 }
 0x2c3   :  { %v600_v38 = vpack.c.bf16 %v1491_v34, %v1491_v34 }
 0x2c5   :  { %964 = vmatmul.msk.bf16.vlgmr.msrb.gmra.mxu1 %vm261_vm1, %v599_v37  ;;  %965 = vmatmul.msk.bf16.vlgmr.msrb.gmra.mxu2 %vm261_vm1, %v600_v38 }
 0x2c8   :  { %v1037_v40 = vpop.eup %1036 }
 0x2c9   :  { %v1499_v41 = vmul.f32 %v1037_v40, %v1025_v6  ;;  %v986_v6 = vld [vmem:[#allocation14 + $0x8] sm:$0xff] }
 0x2ca   :  { %814 = vmatpush.bf16.msra.mxu3 %v986_v6 }
 0x2cb   :  { %v733_v44 = vpack.c.bf16 %v1499_v41, %v1499_v41 }
 0x2ce   :  { %815 = vmatpush.bf16.msra.mxu3 %v985_v7 }
 0x2d1   :  { %v756_v42 = vpop.permute.xlu1 %755 }
 0x2d2   :  { %v761_v43 = vsel %vm331_vm2, %v756_v42, 0 }
 0x2d3   :  { %770 = vmatpush.bf16.msra.mxu2 %v761_v43 }
 0x2d6   :  { %969 = vmatmul.msk.bf16.vlgmr.msra.gmra.mxu2 %vm261_vm1, %v733_v44 }
 0x2d9   :  { %v735_v45 = vpop.permute.xlu1 %734 }
 0x2da   :  { %v740_v46 = vsel %vm331_vm2, %v735_v45, 0 }
 0x2db   :  { %749 = vmatpush.bf16.msra.mxu1 %v740_v46 }
 0x2df   :  { %v713_v47 = vpop.xlane.xlu0 %712 }
 0x2e0   :  { %1038 = vrcp.f32 %v713_v47 }
 0x2e6   :  { %v1039_v48 = vpop.eup %1038 }
 0x2e7   :  { %v719_v49 = vmul.f32 %v1039_v48, %v1027_v15 }
 0x2e9   :  { %v732_v50 = vpack.c.bf16 %v719_v49, %v719_v49 }
 0x2eb   :  { %968 = vmatmul.msk.bf16.vlgmr.msra.gmra.mxu1 %vm261_vm1, %v732_v50 }
 0x330   :  { %v506_v51 = vpop.f32.mrf.mxu2 }
 0x331   :  { %514 = vrot.lane.b32.xlu2 %v506_v51, %s1276_s22 }
 0x332   :  { %v482_v52 = vpop.f32.mrf.mxu1 }
 0x333   :  { %512 = vrot.lane.b32.xlu1 %v482_v52, %s1276_s22  ;;  %v1006_v52 = vld [vmem:[%s1569_s7] ss:$0 sm:$0xff]  ;;  %s1292_s7 = smov [#allocation15]  }
 0x338   :  { %v508_v53 = vpop.f32.mrf.mxu2 }
 0x33a   :  { %v484_v54 = vpop.f32.mrf.mxu1 }
 0x342   :  { %v618_v55 = vpop.f32.mrf.mxu1 }
 0x343   :  { %645 = vrot.lane.b32.xlu1 %v618_v55, %s1288_s28 }
 0x348   :  { %v639_v56 = vpop.f32.mrf.mxu2 }
 0x349   :  { %647 = vrot.lane.b32.xlu0 %v639_v56, %s1288_s28  ;;  %v1007_v56 = vld [vmem:[%s1570_s8] ss:$0 sm:$0xff]  ;;  %s891_s8 = sshll.u32 %s1292_s7, 4  ;;  %s892_s8 = int_to_ptr.vmem [resolvable:$true] %s891_s8 }
 0x34a   :  { %v620_v57 = vpop.f32.mrf.mxu1 }
 0x350   :  { %v641_v58 = vpop.f32.mrf.mxu2 }
 0x351   :  { %453 = vrot.lane.b32.xlu0 %v448_v19, %s1276_s22  ;;  %v1290_v19 = vmov 32.0  }
 0x352   :  { %1040 = vrcp.f32 %v1290_v19 }
 0x358   :  { %v1041_v20 = vpop.eup %1040 }
 0x359   :  { %v772_v59 = vpop.f32.mrf.mxu2  ;;  %v829_v21 = vmul.f32 32.0, %v1041_v20  ;;  %vm833_vm6 = vweird.f32 %v1041_v20 }
 0x35b   :  { %v830_v22 = vsub.f32 1.0, %v829_v21 }
 0x361   :  { %v774_v60 = vpop.f32.mrf.mxu2 }
 0x368   :  { %v751_v61 = vpop.f32.mrf.mxu1 }
 0x369   :  { %778 = vrot.lane.b32.xlu1 %v751_v61, %s1289_s29 }
 0x370   :  { %v753_v62 = vpop.f32.mrf.mxu1 }
 0x371   :  { %780 = vrot.lane.b32.xlu1 %v772_v59, %s1289_s29 }
 0x38b   :  { %v515_v63 = vpop.permute.xlu2 %514 }
 0x38c   :  { %519 = vst.msk [vmem:[#allocation2 + $0x8] sm:$0xff] %vm457_vm3, %v515_v63 }
 0x3a5   :  { %v513_v0 = vpop.permute.xlu1 %512 }
 0x3a6   :  { %518 = vst.msk [vmem:[#allocation2] sm:$0xff] %vm457_vm3, %v513_v0 }
 0x3b5   :  { %v646_v1 = vpop.permute.xlu1 %645 }
 0x3b6   :  { %651 = vst.msk [vmem:[#allocation2] sm:$0xff] %vm596_vm4, %v646_v1 }
 0x3bb   :  { %v648_v2 = vpop.permute.xlu0 %647 }
 0x3bc   :  { %652 = vst.msk [vmem:[#allocation2 + $0x8] sm:$0xff] %vm596_vm4, %v648_v2 }
 0x3c3   :  { %v454_v3 = vpop.permute.xlu0 %453 }
 0x3c4   :  { %459 = vst.msk [vmem:[#allocation16 + $0x8] sm:$0xff] %vm457_vm3, %v454_v3 }
 0x3db   :  { %v779_v8 = vpop.permute.xlu1 %778 }
 0x3dc   :  { %784 = vst.msk [vmem:[#allocation2] sm:$0xff] %vm729_vm5, %v779_v8 }
 0x3e3   :  { %v781_v9 = vpop.permute.xlu1 %780  ;;  %v786_v10 = vld [vmem:[#allocation2] sm:$0xff] }
 0x3e4   :  { %785 = vst.msk [vmem:[#allocation2 + $0x8] sm:$0xff] %vm729_vm5, %v781_v9 }
 0x3eb   :  { %v787_v11 = vld [vmem:[#allocation2 + $0x8] sm:$0xff] }
 0x3ec   :  { %v788_v12 = vpack.c.bf16 %v787_v11, %v786_v10 }
 0x3ee   :  { %978 = vmatmul.msk.bf16.vlgmr.msra.gmra.mxu3 %vm169_vm0, %v788_v12 }
 0x471   :  { %v817_v13 = vpop.f32.mrf.mxu3 }
 0x472   :  { %v818_v14 = vadd.f32 %v817_v13, %v1390_v4  ;;  %v831_v4 = vmul.f32 %v1041_v20, %v830_v22 }
 0x474   :  { %v822_v15 = vsel %vm169_vm0, %v818_v14, 0.0  ;;  %v832_v24 = vadd.f32 %v1041_v20, %v831_v4 }
 0x475   :  { %823 = vadd.xlane.f32.xlu2 %v822_v15 }
 0x476   :  { %v834_v25 = vsel %vm833_vm6, %v1041_v20, %v832_v24 }
 0x479   :  { %v819_v16 = vpop.f32.mrf.mxu3 }
 0x47a   :  { %v820_v17 = vadd.f32 %v819_v16, %v1392_v5 }
 0x47c   :  { %v825_v18 = vsel %vm169_vm0, %v820_v17, 0.0 }
 0x47d   :  { %826 = vadd.xlane.f32.xlu1 %v825_v18 }
 0x496   :  { %451 = vrot.lane.b32.xlu1 %v1481_v23, %s1276_s22 }
 0x49e   :  { %723 = vrot.lane.b32.xlu1 %v719_v49, %s1289_s29 }
 0x4e8   :  { %v824_v26 = vpop.xlane.xlu2 %823 }
 0x4e9   :  { %v835_v27 = vmul.f32 %v834_v25, %v824_v26 }
 0x4eb   :  { %v837_v5 = vsub.f32 %v818_v14, %v835_v27 }
 0x4ed   :  { %v839_v28 = vmul.f32 %v837_v5, %v837_v5 }
 0x4ef   :  { %v841_v29 = vsel %vm169_vm0, %v839_v28, 0.0 }
 0x4f0   :  { %v827_v30 = vpop.xlane.xlu1 %826  ;;  %842 = vadd.xlane.f32.xlu0 %v841_v29 }
 0x4f1   :  { %v836_v23 = vmul.f32 %v834_v25, %v827_v30 }
 0x4f3   :  { %v838_v31 = vsub.f32 %v820_v17, %v836_v23 }
 0x4f5   :  { %v840_v33 = vmul.f32 %v838_v31, %v838_v31 }
 0x4f7   :  { %v844_v35 = vsel %vm169_vm0, %v840_v33, 0.0 }
 0x4f8   :  { %845 = vadd.xlane.f32.xlu2 %v844_v35 }
 0x504   :  { %592 = vrot.lane.b32.xlu0 %v1491_v34, %s1288_s28 }
 0x508   :  { %v452_v36 = vpop.permute.xlu1 %451 }
 0x509   :  { %458 = vst.msk [vmem:[#allocation16] sm:$0xff] %vm457_vm3, %v452_v36 }
 0x50c   :  { %725 = vrot.lane.b32.xlu0 %v1499_v41, %s1289_s29 }
 0x510   :  { %590 = vrot.lane.b32.xlu2 %v1489_v32, %s1288_s28  ;;  %v724_v48 = vpop.permute.xlu1 %723 }
 0x563   :  { %v843_v37 = vpop.xlane.xlu0 %842 }
 0x564   :  { %v847_v38 = vmul.f32 %v843_v37, %v834_v25 }
 0x566   :  { %v849_v39 = vadd.f32 1e-06, %v847_v38 }
 0x568   :  { %1042 = vrsqrt.f32 %v849_v39  ;;  %vm857_vm8 = vweird.f32 %v849_v39 }
 0x56b   :  { %v846_v40 = vpop.xlane.xlu2 %845 }
 0x56c   :  { %v848_v42 = vmul.f32 %v846_v40, %v834_v25 }
 0x56e   :  { %v1043_v43 = vpop.eup %1042  ;;  %v850_v44 = vadd.f32 1e-06, %v848_v42 }
 0x56f   :  { %v852_v45 = vmul.f32 %v1043_v43, %v849_v39  ;;  %vm858_vm7 = vweird.f32 %v1043_v43 }
 0x570   :  { %1044 = vrsqrt.f32 %v850_v44  ;;  %vm859_vm9 = vmor %vm857_vm8, %vm858_vm7  ;;  %vm867_vm11 = vweird.f32 %v850_v44 }
 0x571   :  { %v853_v34 = vmul.f32 %v1043_v43, %v852_v45 }
 0x573   :  { %v854_v46 = vmul.f32 0.5, %v853_v34  ;;  %v591_v47 = vpop.permute.xlu2 %590 }
 0x574   :  { %597 = vst.msk [vmem:[#allocation16] sm:$0xff] %vm596_vm4, %v591_v47 }
 0x575   :  { %v855_v41 = vsub.f32 1.5, %v854_v46  ;;  %730 = vst.msk [vmem:[#allocation16] sm:$0xff] %vm729_vm5, %v724_v48 }
 0x576   :  { %v1045_v32 = vpop.eup %1044  ;;  %v593_v49 = vpop.permute.xlu0 %592 }
 0x577   :  { %v856_v50 = vmul.f32 %v1043_v43, %v855_v41  ;;  %v862_v51 = vmul.f32 %v1045_v32, %v850_v44  ;;  %598 = vst.msk [vmem:[#allocation16 + $0x8] sm:$0xff] %vm596_vm4, %v593_v49  ;;  %vm868_vm10 = vweird.f32 %v1045_v32 }
 0x578   :  { %vm869_vm12 = vmor %vm867_vm11, %vm868_vm10 }
 0x579   :  { %v860_v53 = vsel %vm859_vm9, %v1043_v43, %v856_v50  ;;  %v863_v54 = vmul.f32 %v1045_v32, %v862_v51 }
 0x57a   :  { %v871_v55 = vmul.f32 %v860_v53, %v837_v5 }
 0x57b   :  { %v864_v57 = vmul.f32 0.5, %v863_v54 }
 0x57c   :  { %v877_v58 = vmul.f32 %v1006_v52, %v871_v55 }
 0x57d   :  { %v865_v59 = vsub.f32 1.5, %v864_v57 }
 0x57e   :  { %v726_v60 = vpop.permute.xlu0 %725  ;;  %v883_v61 = vadd.f32 %v1007_v56, %v877_v58 }
 0x57f   :  { %v866_v62 = vmul.f32 %v1045_v32, %v865_v59  ;;  %731 = vst.msk [vmem:[#allocation16 + $0x8] sm:$0xff] %vm729_vm5, %v726_v60 }
 0x580   :  { %885 = vst.msk [vmem:[#allocation15] sm:$0xff] %vm169_vm0, %v883_v61  ;;  %912 = dma.vmem_to_hbm [thread:$0]  %s905_s15, 256, %s907_s5, [#allocation17], %s1275_s21, %s1275_s21, %s1276_s22  }
 0x581   :  { %v870_v63 = vsel %vm869_vm12, %v1045_v32, %v866_v62 }
 0x582   :  { %v872_v0 = vmul.f32 %v870_v63, %v838_v31 }
 0x584   :  { %v878_v1 = vmul.f32 %v1006_v52, %v872_v0 }
 0x586   :  { %v884_v2 = vadd.f32 %v1007_v56, %v878_v1 }
 0x588   :  { %886 = vst.msk [vmem:[#allocation15 + $0x8] sm:$0xff] %vm169_vm0, %v884_v2 }
 0x589   :  { %899 = dma.vmem_to_hbm [thread:$0]  %s892_s8, 256, %s894_s0, [#allocation5], %s1275_s21, %s1275_s21, %s1276_s22  }
 0x58a   :  { %1270 = dma.done.wait [#allocation5], 256  }
 0x58b   :  { %1271 = vsyncadd [#allocation5], 4294967040 }
 0x58c   :  { %1272 = dma.done.wait [#allocation17], 256  }
 0x58d   :  { %1273 = vsyncadd [#allocation17], 4294967040 }
 0x58e   :  { %921 = vsyncpa [#allocation4], 1 }
 0x58f   :  { %922 = vsyncpa [#allocation7], 1 }
 0x590   :  { %923 = vsyncpa [#allocation10], 1 }
 0x591   :  { %924 = vsyncpa [#allocation13], 1 }
 0x592   :  { %925 = vsyncpa [#allocation5], 1 }
 0x593   :  { %926 = vsyncpa [#allocation17], 1 }

</bundles_post_ra>
